<compile_context>
chip_gen: v7x
topology: tpu7x:2x2x1
jax: 0.10.0
libtpu: 0.0.40
codegen_flags: <defaults>
</compile_context>

<pallas_src>
import jax
import jax.numpy as jnp
from jax.experimental import pallas as pl
from jax.experimental.pallas import tpu as pltpu

_LANE = 128
# Per-block byte target for the blocked scaffolding kernel.  Double-buffered
# in + out = 4 x block_bytes = 8 MiB, comfortably inside the default scoped
# VMEM on every generation (v5e 16 MiB, v6e 32 MiB, v7x 32 of 64 MiB).
_TARGET_BLOCK_BYTES = 2 * 1024 * 1024
# Lane-multiple widths tried when re-folding flat/short audio into a tall slab
# so every (sublane, 128) vreg is fully occupied.
_FOLD_WIDTHS = (4096, 2048, 1024, 512, 256, 128)


def _sublane_unit(dtype) -> int:
    """Native sublane rows per vreg for this dtype: 8 f32, 16 bf16, 32 int8."""
    itemsize = jnp.dtype(dtype).itemsize
    return max(8, 32 // max(1, itemsize))


# --------------------------------------------------------------------------
# Kernels
# --------------------------------------------------------------------------
def _identity_block_kernel(x_ref, o_ref):
    # transform_audio = torch.nn.Identity(); real elementwise augmentations
    # (noise, gain, SpecAugment masking, ...) would replace this body.
    o_ref[...] = x_ref[...]


def _identity_dma_kernel(x_hbm_ref, o_hbm_ref, sem):
    # Direct HBM->HBM DMA: skips the HBM->VMEM->HBM round trip and all
    # in-kernel vld/vst work; runs purely at DMA-engine / HBM rate.
    copy = pltpu.make_async_copy(x_hbm_ref, o_hbm_ref, sem)
    copy.start()
    copy.wait()


# --------------------------------------------------------------------------
# Tiling helpers
# --------------------------------------------------------------------------
def _as_slab(audio: jax.Array) -> jax.Array:
    """Present a lane-dense 2-D slab; re-fold flat/short inputs so the row
    count fills the vreg sublanes (a (1,C)/(2,C) block only fills 1/8-1/4 of
    each (8,128) vreg and makes the single vst slot the bottleneck)."""
    if audio.ndim >= 2:
        x = audio.reshape(-1, audio.shape[-1])
    else:
        x = audio.reshape(1, -1)
    rows, cols = x.shape
    sub = _sublane_unit(x.dtype)
    if rows < sub:
        total = rows * cols
        for width in _FOLD_WIDTHS:
            if total % width == 0 and total // width >= sub:
                return x.reshape(total // width, width)
    return x


def _choose_blocks(rows, cols, dtype):
    """Largest legal, lane-dense block under the VMEM byte budget."""
    itemsize = jnp.dtype(dtype).itemsize
    sub = _sublane_unit(dtype)

    # Last dim: full extent when it fits the budget at one sublane group
    # (always legal), otherwise the largest multiple of 128 lanes that does;
    # the cdiv grid masks the remainder block.
    if cols * sub * itemsize <= _TARGET_BLOCK_BYTES or cols <= _LANE:
        block_cols = cols
    else:
        budget_cols = _TARGET_BLOCK_BYTES // (sub * itemsize)
        block_cols = min(cols // _LANE * _LANE,
                         max(_LANE, budget_cols // _LANE * _LANE))

    # Rows: full extent when small, otherwise the largest multiple of the
    # native sublane count that keeps the block under the byte budget
    # (no 8-row cap -> few, fat blocks; pipeline step overhead amortized).
    row_budget = max(1, _TARGET_BLOCK_BYTES // (block_cols * itemsize))
    if rows <= row_budget:
        block_rows = rows
    else:
        block_rows = max(sub, row_budget // sub * sub)

    # v7x: a degenerate (1,1) grid cannot shard across the two TensorCores of
    # this purely mem-bound copy; split rows into >=2 parallel steps when the
    # array is tall enough.  No-op on v5e/v6e (1 TC).
    if block_rows == rows and block_cols == cols and rows >= 2 * sub:
        block_rows = pl.cdiv(pl.cdiv(rows, 2), sub) * sub

    return block_rows, block_cols


# --------------------------------------------------------------------------
# Pallas-backed identity paths
# --------------------------------------------------------------------------
def _identity_pallas_blocked(audio: jax.Array, *, donate: bool = False) -> jax.Array:
    """Identity audio transform as a tiled VMEM Pallas kernel (scaffolding)."""
    orig_shape = audio.shape
    x = _as_slab(audio)
    rows, cols = x.shape
    itemsize = jnp.dtype(x.dtype).itemsize
    block_rows, block_cols = _choose_blocks(rows, cols, x.dtype)
    grid = (pl.cdiv(rows, block_rows), pl.cdiv(cols, block_cols))

    out = pl.pallas_call(
        _identity_block_kernel,
        out_shape=jax.ShapeDtypeStruct((rows, cols), x.dtype),
        grid=grid,
        in_specs=[pl.BlockSpec((block_rows, block_cols), lambda i, j: (i, j))],
        out_specs=pl.BlockSpec((block_rows, block_cols), lambda i, j: (i, j)),
        # Only alias when the caller actually donates the audio buffer;
        # otherwise XLA inserts a defensive copy that doubles HBM traffic.
        input_output_aliases={0: 0} if donate else {},
        cost_estimate=pl.CostEstimate(
            flops=0, transcendentals=0,
            bytes_accessed=2 * rows * cols * itemsize),
        compiler_params=pltpu.CompilerParams(
            dimension_semantics=("parallel", "parallel"),
        ),
    )(x)
    return out.reshape(orig_shape)


def _identity_pallas_dma(audio: jax.Array) -> jax.Array:
    """Identity audio transform as a single HBM->HBM DMA (no VMEM staging)."""
    nbytes = audio.size * jnp.dtype(audio.dtype).itemsize
    return pl.pallas_call(
        _identity_dma_kernel,
        out_shape=jax.ShapeDtypeStruct(audio.shape, audio.dtype),
        in_specs=[pl.BlockSpec(memory_space=pl.ANY)],
        out_specs=pl.BlockSpec(memory_space=pl.ANY),
        scratch_shapes=[pltpu.SemaphoreType.DMA],
        cost_estimate=pl.CostEstimate(
            flops=0, transcendentals=0, bytes_accessed=2 * nbytes),
    )(audio)


# --------------------------------------------------------------------------
# Module equivalent
# --------------------------------------------------------------------------
class BatchAugmentorPallas:
    """JAX/Pallas equivalent of BatchAugmentor(BatchAugmentation()).

    mode:
      "passthrough" (default): the base augmentation is torch.nn.Identity, so
          the fastest correct path returns the audio untouched -- zero HBM
          traffic, no kernel launch.
      "dma":     whole-array HBM->HBM DMA copy (fresh output buffer, no VMEM).
      "blocked": tiled VMEM copy kernel, the hook where real elementwise
          augmentations would plug in.
    """

    def __init__(self, mode: str = "passthrough", donate: bool = False):
        assert mode in ("passthrough", "dma", "blocked")
        self.mode = mode
        self.donate = donate

    def __call__(self, batch):
        audio, labels = batch
        if self.mode == "passthrough":
            augmented_audio = audio                       # torch.nn.Identity()
        elif self.mode == "dma":
            augmented_audio = _identity_pallas_dma(audio)
        else:
            # TODO(synk): drop the donate alias before plugging augmentations
            # that read across block boundaries (roll / mixup / warp).
            augmented_audio = _identity_pallas_blocked(audio, donate=self.donate)
        # Labels (tensor or dict of tensors) pass through untouched.
        return (augmented_audio, labels)


if __name__ == "__main__":
    key = jax.random.PRNGKey(0)
    k_audio, k_labels = jax.random.split(key)

    # Small whisper-like synthetic batch: (batch=2, samples=1024) f32 audio,
    # (batch=2, seq=8) int32 token labels.
    audio = jax.random.normal(k_audio, (2, 1024), dtype=jnp.float32)
    labels = jax.random.randint(k_labels, (2, 8), 0, 51865, dtype=jnp.int32)

    # Default (fastest) path: Identity augmentation launches no kernel at all.
    out_audio, out_labels = BatchAugmentorPallas()((audio, labels))
    assert out_audio is audio and out_labels is labels

    # Scaffolding kernel paths: run once each and validate exact identity.
    blk_audio, blk_labels = BatchAugmentorPallas(mode="blocked")((audio, labels))
    blk_audio = jax.block_until_ready(blk_audio)
    assert blk_audio.shape == audio.shape and blk_audio.dtype == audio.dtype
    assert bool(jnp.array_equal(blk_audio, audio))
    assert blk_labels is labels

    dma_audio, _ = BatchAugmentorPallas(mode="dma")((audio, labels))
    dma_audio = jax.block_until_ready(dma_audio)
    assert bool(jnp.array_equal(dma_audio, audio))

    print("KERNEL_OK")
</pallas_src>

<mosaic_0001>
module attributes {stable_mosaic.version = 11 : i64} {
  func.func @_identity_block_kernel(%arg0: i32, %arg1: i32, %arg2: memref<8x256xf32, #tpu.memory_space<vmem>>, %arg3: memref<8x256xf32, #tpu.memory_space<vmem>>) attributes {dimension_semantics = [#tpu.dimension_semantics<parallel>, #tpu.dimension_semantics<parallel>], iteration_bounds = array<i64: 1, 1>, scalar_prefetch = 0 : i64, scratch_operands = 0 : i64, tpu.core_type = #tpu.core_type<tc>, window_params = [{transform_indices = @transform_0, window_bounds = array<i64: 8, 256>}, {transform_indices = @transform_1, window_bounds = array<i64: 8, 256>}]} {
    %c0 = arith.constant 0 : index
    %c0_0 = arith.constant 0 : index
    %0 = vector.load %arg2[%c0, %c0_0] : memref<8x256xf32, #tpu.memory_space<vmem>>, vector<8x256xf32>
    %c0_1 = arith.constant 0 : index
    %c0_2 = arith.constant 0 : index
    %1 = vector.load %arg3[%c0_1, %c0_2] : memref<8x256xf32, #tpu.memory_space<vmem>>, vector<8x256xf32>
    tpu.vector_store %arg3[%c0_1, %c0_2], %0 {strides = array<i32>} : memref<8x256xf32, #tpu.memory_space<vmem>>, vector<8x256xf32>,
    return
  }
  func.func @transform_0(%arg0: i32, %arg1: i32) -> (i32, i32) {
    %c0_i32 = arith.constant 0 : i32
    return %arg0, %arg1 : i32, i32
  }
  func.func @transform_1(%arg0: i32, %arg1: i32) -> (i32, i32) {
    %c0_i32 = arith.constant 0 : i32
    return %arg0, %arg1 : i32, i32
  }
}

</mosaic_0001>

<bundles_post_ra>
// kernel: tpu_custom_call.1
= control target key start
LH: loop header
LB: loop body
LE: loop exit
PB: predicated region body
PF: predicated region fallthrough
CT: control target
= control target key end

     0   :  { %6 = vsyncpa [#allocation3], 0  ;;  %s126_s0 = inlined_call_operand.hbm [shape: f32[8,256], index: 0, kind: input, shape index: {}]   ;;  %s127_s1 = inlined_call_operand.hbm [shape: f32[8,256], index: 1, kind: output, shape index: {}]  }
   0x1   :  { %7 = vsyncpa [#allocation4], 0  ;;  %s90_s6 = smov [#allocation2]   ;;  %s42_s10 = scalar_lea.hbm %s126_s0, 256 }
   0x2   :  { %s14_s7 = sshll.u32 %s90_s6, 4  ;;  %p43_p0 = scmp.ne.s32.totalorder %s126_s0, %s42_s10  ;;  %s15_s7 = int_to_ptr.vmem [resolvable:$true] %s14_s7 }
   0x3   :  { %p46_p1 = scmp.lt.u32.totalorder %s42_s10, %s126_s0 }
   0x5   :  { %p48_p2 = pnand %p46_p1, %p43_p0 }
   0x7   :  { %51 = shalt.err (!%p48_p2)
}
   0x8   :  { %s52_s15 = scalar_lea.vmem %s15_s7, 256  ;;  %p57_p4 = scmp.lt.s32.totalorder %s15_s7, %s15_s7 }
   0x9   :  { %p53_p3 = scmp.ne.s32.totalorder %s15_s7, %s52_s15  ;;  %p58_p5 = scmp.lt.s32.totalorder %s52_s15, %s52_s15 }
   0xb   :  { %p59_p6 = por %p58_p5, %p57_p4 }
   0xd   :  { %p60_p7 = pnand %p59_p6, %p53_p3 }
   0xf   :  { %63 = shalt.err (!%p60_p7)
}
  0x10   :  { %17 = dma.hbm_to_vmem [thread:$0]  %s126_s0, 256, %s15_s7, [#allocation3]  }
  0x11   :  { %86 = dma.done.wait [#allocation3], 256  }
  0x12   :  { %87 = vsyncadd [#allocation3], 4294967040  ;;  %s91_s18 = smov [#allocation5]   ;;  %v21_v0 = vld [vmem:[#allocation2] sm:$0xff]  ;;  %v22_v1 = vld [vmem:[#allocation2 + $0x8] sm:$0xff] }
  0x13   :  { %s31_s19 = sshll.u32 %s91_s18, 4  ;;  %23 = vst [vmem:[#allocation5] sm:$0xff] %v21_v0  ;;  %24 = vst [vmem:[#allocation5 + $0x8] sm:$0xff] %v22_v1  ;;  %s32_s19 = int_to_ptr.vmem [resolvable:$true] %s31_s19 }
  0x14   :  { %s64_s20 = scalar_lea.vmem %s32_s19, 256  ;;  %p69_p9 = scmp.lt.s32.totalorder %s32_s19, %s32_s19 }
  0x15   :  { %p65_p8 = scmp.ne.s32.totalorder %s32_s19, %s64_s20  ;;  %p70_p10 = scmp.lt.s32.totalorder %s64_s20, %s64_s20 }
  0x17   :  { %p71_p11 = por %p70_p10, %p69_p9 }
  0x19   :  { %p72_p12 = pnand %p71_p11, %p65_p8 }
  0x1b   :  { %75 = shalt.err (!%p72_p12)
}
  0x1c   :  { %s76_s0 = scalar_lea.hbm %s127_s1, 256 }
  0x1d   :  { %p77_p13 = scmp.ne.s32.totalorder %s127_s1, %s76_s0  ;;  %p80_p0 = scmp.lt.u32.totalorder %s76_s0, %s127_s1 }
  0x1f   :  { %p82_p1 = pnand %p80_p0, %p77_p13 }
  0x21   :  { %85 = shalt.err (!%p82_p1)
}
  0x22   :  { %34 = dma.vmem_to_hbm [thread:$0]  %s32_s19, 256, %s127_s1, [#allocation4]  }
  0x23   :  { %88 = dma.done.wait [#allocation4], 256  }
  0x24   :  { %89 = vsyncadd [#allocation4], 4294967040 }
  0x25   :  { %38 = vsyncpa [#allocation3], 1 }
  0x26   :  { %39 = vsyncpa [#allocation4], 1 }

</bundles_post_ra>
